<compile_context>
chip_gen: v5e
topology: v5e:2x2
jax: 0.10.0
libtpu: 0.0.40
codegen_flags: <defaults>
</compile_context>

<pallas_src>
import jax
import jax.numpy as jnp
from jax.experimental import pallas as pl
from jax.experimental.pallas import tpu as pltpu

# ---- hard-coded hyperparameters standing in for argparse `args` ----
NB_DOTS = 4          # args.nb_dots
ALPHA = 0.5          # args.alpha
BETA = 2.0           # args.beta
SIZE = 16            # args.size  (image spatial size)
RADIUS_RATIO = 0.25  # args.radius_ratio
RADIUS = float(SIZE) * RADIUS_RATIO
MEANS = (0.5, 0.5, 0.5)
STDS = (0.5, 0.5, 0.5)
NUM_CLASSES = 10

C = 3
H = SIZE
W = SIZE
HW = H * W
CHW = C * HW                                         # 768 (lane-dense, 6x128)
LANE = 128
K_PAD = ((NUM_CLASSES + LANE - 1) // LANE) * LANE    # 128

# Max rows per grid step.  Double-buffered footprint:
#   2*(1024*768*4) x + 2*(1024*128*4) out + 2*(768*128*4) W + blend tiles ~ 7.5 MiB
# -> fits v5e's 16 MiB scoped VMEM default; large headroom on v6e/v7x.
MAX_TILE_N = 1024


# --------------------- fused AttackModel kernel ---------------------
def attack_kernel(scale_ref, addend_ref, x_ref, w_ref, b_ref, o_ref):
    """Composed ImageDot affine blend + frozen linear head on one batch tile."""
    # (1, CHW) broadcast against (TILE_N, CHW): one fused multiply-add per element.
    x = scale_ref[...] * x_ref[...].astype(jnp.float32) + addend_ref[...]
    # Frozen linear classifier head (zero-padded to K_PAD=128 -> unmasked stores).
    o_ref[...] = (
        jnp.dot(x, w_ref[...], preferred_element_type=jnp.float32) + b_ref[...]
    ).astype(o_ref.dtype)


def _compose_blend(center, color):
    """Fold the NB_DOTS sequential blends into one affine over the (1, CHW) layout.

    Each dot applies x <- s*x + a with s = (1 - alpha*mask), a = alpha*mask*color.
    Composing sequentially: (S, A) <- (s*S, s*A + a).  Batch-independent & tiny.
    """
    hw_idx = jnp.arange(HW, dtype=jnp.int32)
    hv = (hw_idx // W).astype(jnp.float32)
    wv = (hw_idx % W).astype(jnp.float32)
    inv_r2 = 1.0 / (RADIUS * RADIUS)
    means = jnp.asarray(MEANS, jnp.float32)
    stds = jnp.asarray(STDS, jnp.float32)

    scale_tot = jnp.ones((CHW,), jnp.float32)
    addend_tot = jnp.zeros((CHW,), jnp.float32)
    for idx in range(NB_DOTS):
        cy = center[idx, 0] * W                       # center scaled by width (as in torch)
        cx = center[idx, 1] * W
        d = ((hv - cy) ** 2 + (wv - cx) ** 2) * inv_r2
        d_beta = d * d if BETA == 2.0 else d ** BETA  # avoid float pow for beta == 2
        am = ALPHA * jnp.exp(-d_beta + 1e-10)         # alpha * _create_circle_mask
        col = (color[idx] - means) / stds             # _normalize_color
        scale_c = jnp.tile(1.0 - am, (C,))                              # (CHW,)
        addend_c = jnp.concatenate([am * col[c] for c in range(C)])     # (CHW,)
        scale_tot = scale_c * scale_tot
        addend_tot = scale_c * addend_tot + addend_c
    return scale_tot.reshape(1, CHW), addend_tot.reshape(1, CHW)


def pad_classifier(w_cls, b_cls):
    """Zero-pad frozen classifier to K_PAD classes ONCE (outside per-call path)."""
    w_pad = jnp.zeros((CHW, K_PAD), jnp.float32).at[:, :NUM_CLASSES].set(w_cls)
    b_pad = jnp.zeros((1, K_PAD), jnp.float32).at[:, :NUM_CLASSES].set(
        b_cls.reshape(1, -1))
    return w_pad, b_pad


@jax.jit
def attack_model_forward(x, center, color, w_pad, b_pad):
    n = x.shape[0]
    x_flat = x.reshape(n, CHW)                        # glue reshape (plain JAX)
    scale, addend = _compose_blend(center, color)     # batch-independent, hoisted

    # Batch tiling (static shape logic under jit).
    if n <= MAX_TILE_N:
        tile_n, n_pad = n, n
    else:
        tile_n = MAX_TILE_N
        n_pad = ((n + tile_n - 1) // tile_n) * tile_n
        if n_pad != n:
            x_flat = jnp.pad(x_flat, ((0, n_pad - n), (0, 0)))
    grid = (n_pad // tile_n,)

    cost = pl.CostEstimate(
        flops=2 * n_pad * CHW * K_PAD + 2 * n_pad * CHW,
        transcendentals=0,
        bytes_accessed=n_pad * CHW * 4 + CHW * K_PAD * 4 + n_pad * K_PAD * 4)

    out = pl.pallas_call(
        attack_kernel,
        out_shape=jax.ShapeDtypeStruct((n_pad, K_PAD), jnp.float32),
        grid_spec=pltpu.PrefetchScalarGridSpec(
            num_scalar_prefetch=0,
            grid=grid,
            in_specs=[
                pl.BlockSpec((1, CHW), lambda i: (0, 0)),        # scale_tot (resident)
                pl.BlockSpec((1, CHW), lambda i: (0, 0)),        # addend_tot (resident)
                pl.BlockSpec((tile_n, CHW), lambda i: (i, 0)),   # x tile (streamed)
                pl.BlockSpec((CHW, K_PAD), lambda i: (0, 0)),    # W (resident)
                pl.BlockSpec((1, K_PAD), lambda i: (0, 0)),      # b (resident)
            ],
            out_specs=pl.BlockSpec((tile_n, K_PAD), lambda i: (i, 0)),
        ),
        compiler_params=pltpu.CompilerParams(
            dimension_semantics=("parallel",)),                  # v7x megacore sharding
        cost_estimate=cost,
    )(scale, addend, x_flat, w_pad, b_pad)

    return out[:n, :NUM_CLASSES]


# ----------------------- pure-JAX reference ------------------------
def reference_forward(x, center, color, w_cls, b_cls):
    n, c, h, w = x.shape
    hv, wv = jnp.meshgrid(jnp.arange(h, dtype=jnp.float32),
                          jnp.arange(w, dtype=jnp.float32), indexing="ij")
    blended = x.astype(jnp.float32)
    for idx in range(NB_DOTS):
        cy = center[idx, 0] * w
        cx = center[idx, 1] * w
        d = ((hv - cy) ** 2 + (wv - cx) ** 2) / (RADIUS ** 2)
        mask = jnp.exp(-(d ** BETA) + 1e-10)
        am = ALPHA * mask
        col = (color[idx] - jnp.array(MEANS)) / jnp.array(STDS)
        color_tile = jnp.broadcast_to(col[None, :, None, None], blended.shape)
        blended = (1.0 - am)[None, None] * blended + am[None, None] * color_tile
    flat = blended.reshape(n, -1)
    return flat @ w_cls + b_cls


if __name__ == "__main__":
    key = jax.random.PRNGKey(0)
    k_x, k_c, k_col, k_w = jax.random.split(key, 4)

    N = 2
    x = jax.random.normal(k_x, (N, C, H, W), dtype=jnp.float32)

    # ImageDot parameters (uniform [0,1), as np.random.random in __init__)
    center = jax.random.uniform(k_c, (NB_DOTS, 2), dtype=jnp.float32)
    color = jax.random.uniform(k_col, (NB_DOTS, 3), dtype=jnp.float32)

    # Deterministic synthetic frozen linear-classifier weights
    w_cls = 0.02 * jax.random.normal(k_w, (CHW, NUM_CLASSES), dtype=jnp.float32)
    b_cls = jnp.zeros((1, NUM_CLASSES), dtype=jnp.float32)

    # Pad frozen weights ONCE (outside the jitted per-call path).
    w_pad, b_pad = pad_classifier(w_cls, b_cls)

    out = attack_model_forward(x, center, color, w_pad, b_pad)
    out = jax.block_until_ready(out)

    ref = reference_forward(x, center, color, w_cls, b_cls)
    assert out.shape == (N, NUM_CLASSES)
    assert jnp.allclose(out, ref, atol=1e-4, rtol=1e-4), (
        float(jnp.max(jnp.abs(out - ref))))

    print("KERNEL_OK")
</pallas_src>

<mosaic_0001>
module attributes {stable_mosaic.version = 11 : i64} {
  func.func @attack_kernel(%arg0: i32, %arg1: memref<1x768xf32, #tpu.memory_space<vmem>>, %arg2: memref<1x768xf32, #tpu.memory_space<vmem>>, %arg3: memref<2x768xf32, #tpu.memory_space<vmem>>, %arg4: memref<768x128xf32, #tpu.memory_space<vmem>>, %arg5: memref<1x128xf32, #tpu.memory_space<vmem>>, %arg6: memref<2x128xf32, #tpu.memory_space<vmem>>) attributes {dimension_semantics = [#tpu.dimension_semantics<parallel>], iteration_bounds = array<i64: 1>, scalar_prefetch = 0 : i64, scratch_operands = 0 : i64, tpu.core_type = #tpu.core_type<tc>, window_params = [{pipeline_mode = #tpu.pipeline_mode<synchronous>, transform_indices = @transform_0, window_bounds = array<i64: 1, 768>}, {pipeline_mode = #tpu.pipeline_mode<synchronous>, transform_indices = @transform_1, window_bounds = array<i64: 1, 768>}, {transform_indices = @transform_2, window_bounds = array<i64: 2, 768>}, {pipeline_mode = #tpu.pipeline_mode<synchronous>, transform_indices = @transform_3, window_bounds = array<i64: 768, 128>}, {pipeline_mode = #tpu.pipeline_mode<synchronous>, transform_indices = @transform_4, window_bounds = array<i64: 1, 128>}, {transform_indices = @transform_5, window_bounds = array<i64: 2, 128>}]} {
    %c0 = arith.constant 0 : index
    %c0_0 = arith.constant 0 : index
    %0 = vector.load %arg1[%c0, %c0_0] : memref<1x768xf32, #tpu.memory_space<vmem>>, vector<1x768xf32>
    %c0_1 = arith.constant 0 : index
    %c0_2 = arith.constant 0 : index
    %1 = vector.load %arg3[%c0_1, %c0_2] : memref<2x768xf32, #tpu.memory_space<vmem>>, vector<2x768xf32>
    %2 = vector.broadcast %0 : vector<1x768xf32> to vector<2x768xf32>
    %3 = arith.mulf %2, %1 : vector<2x768xf32>
    %c0_3 = arith.constant 0 : index
    %c0_4 = arith.constant 0 : index
    %4 = vector.load %arg2[%c0_3, %c0_4] : memref<1x768xf32, #tpu.memory_space<vmem>>, vector<1x768xf32>
    %5 = vector.broadcast %4 : vector<1x768xf32> to vector<2x768xf32>
    %6 = arith.addf %3, %5 : vector<2x768xf32>
    %c0_5 = arith.constant 0 : index
    %c0_6 = arith.constant 0 : index
    %7 = vector.load %arg4[%c0_5, %c0_6] : memref<768x128xf32, #tpu.memory_space<vmem>>, vector<768x128xf32>
    %cst = arith.constant dense<0.000000e+00> : vector<2x128xf32>
    %8 = tpu.matmul %6, %7, %cst {dimension_numbers = #tpu.dot_dimension_numbers<[1], [0], [0], [1], [0, 0, 1, 1], [], []>} : vector<2x768xf32>, vector<768x128xf32>, vector<2x128xf32> -> vector<2x128xf32>
    %c0_7 = arith.constant 0 : index
    %c0_8 = arith.constant 0 : index
    %9 = vector.load %arg5[%c0_7, %c0_8] : memref<1x128xf32, #tpu.memory_space<vmem>>, vector<1x128xf32>
    %10 = vector.broadcast %9 : vector<1x128xf32> to vector<2x128xf32>
    %11 = arith.addf %8, %10 : vector<2x128xf32>
    %c0_9 = arith.constant 0 : index
    %c0_10 = arith.constant 0 : index
    %12 = vector.load %arg6[%c0_9, %c0_10] : memref<2x128xf32, #tpu.memory_space<vmem>>, vector<2x128xf32>
    tpu.vector_store %arg6[%c0_9, %c0_10], %11 {strides = array<i32>} : memref<2x128xf32, #tpu.memory_space<vmem>>, vector<2x128xf32>,
    return
  }
  func.func @transform_0(%arg0: i32) -> (i32, i32) {
    %c0_i32 = arith.constant 0 : i32
    %c0_i32_0 = arith.constant 0 : i32
    %c0_i32_1 = arith.constant 0 : i32
    return %c0_i32, %c0_i32_0 : i32, i32
  }
  func.func @transform_1(%arg0: i32) -> (i32, i32) {
    %c0_i32 = arith.constant 0 : i32
    %c0_i32_0 = arith.constant 0 : i32
    %c0_i32_1 = arith.constant 0 : i32
    return %c0_i32, %c0_i32_0 : i32, i32
  }
  func.func @transform_2(%arg0: i32) -> (i32, i32) {
    %c0_i32 = arith.constant 0 : i32
    %c0_i32_0 = arith.constant 0 : i32
    return %arg0, %c0_i32 : i32, i32
  }
  func.func @transform_3(%arg0: i32) -> (i32, i32) {
    %c0_i32 = arith.constant 0 : i32
    %c0_i32_0 = arith.constant 0 : i32
    %c0_i32_1 = arith.constant 0 : i32
    return %c0_i32, %c0_i32_0 : i32, i32
  }
  func.func @transform_4(%arg0: i32) -> (i32, i32) {
    %c0_i32 = arith.constant 0 : i32
    %c0_i32_0 = arith.constant 0 : i32
    %c0_i32_1 = arith.constant 0 : i32
    return %c0_i32, %c0_i32_0 : i32, i32
  }
  func.func @transform_5(%arg0: i32) -> (i32, i32) {
    %c0_i32 = arith.constant 0 : i32
    %c0_i32_0 = arith.constant 0 : i32
    return %arg0, %c0_i32 : i32, i32
  }
}

</mosaic_0001>

<bundles_post_ra>
// kernel: attack_model_forward.1
= control target key start
LH: loop header
LB: loop body
LE: loop exit
PB: predicated region body
PF: predicated region fallthrough
CT: control target
= control target key end

     0   :  { %10 = vsyncpa [#allocation3], 0  ;;  %s462_s0 = inlined_call_operand.vmem [shape: f32[1,768], index: 0, kind: input, shape index: {}]   ;;  %s463_s1 = inlined_call_operand.vmem [shape: f32[1,768], index: 1, kind: input, shape index: {}]   ;;  %s464_s2 = inlined_call_operand.vmem [shape: f32[2,768], index: 2, kind: input, shape index: {}]   ;;  %s465_s3 = inlined_call_operand.hbm [shape: f32[768,128], index: 3, kind: input, shape index: {}]   ;;  %s466_s4 = inlined_call_operand.vmem [shape: f32[1,128], index: 4, kind: input, shape index: {}]   ;;  %s467_s5 = inlined_call_operand.hbm [shape: f32[2,128], index: 5, kind: output, shape index: {}]  }
   0x1   :  { %11 = vsyncpa [#allocation4], 0  ;;  %s22_s20 = sshll.u32 %s465_s3, 4  ;;  %s391_s21 = smov [#allocation2]   ;;  %s23_s20 = int_to_ptr.hbm [resolvable:$true] %s22_s20 }
   0x2   :  { %s24_s22 = sshll.u32 %s391_s21, 4  ;;  %s392_s23 = smov 128   ;;  %s25_s22 = int_to_ptr.vmem [resolvable:$true] %s24_s22 }
   0x3   :  { %s393_s24 = smov 8  }
   0x4   :  { %30 = dma.hbm_to_vmem [thread:$0]  %s23_s20, 12288, %s25_s22, [#allocation3], %s392_s23, %s392_s23, %s393_s24  }
   0x5   :  { %387 = dma.done.wait [#allocation3], 12288  }
   0x6   :  { %388 = vsyncadd [#allocation3], 4294955008  ;;  %v111_v0 = vld [vmem:[#allocation2 + $0x78] sm:$0xff]  ;;  %v110_v1 = vld [vmem:[#allocation2 + $0x70] sm:$0xff]  ;;  %s394_s6 = smov [#allocation5]   ;;  %s324_s10 = sshll.u32 %s467_s5, 4  ;;  %s325_s10 = int_to_ptr.hbm [resolvable:$true] %s324_s10 }
   0x7   :  { %v127_v2 = vld [vmem:[#allocation2 + $0xf8] sm:$0xff]  ;;  %196 = vmatpush.msra.mxu0 %v111_v0  ;;  %v126_v3 = vld [vmem:[#allocation2 + $0xf0] sm:$0xff]  ;;  %v109_v4 = vld [vmem:[#allocation2 + $0x68] sm:$0xff]  ;;  %s322_s7 = sshll.u32 %s394_s6, 4  ;;  %s323_s7 = int_to_ptr.vmem [resolvable:$true] %s322_s7 }
   0x8   :  { %216 = vmatpush.msra.mxu1 %v127_v2  ;;  %v125_v5 = vld [vmem:[#allocation2 + $0xe8] sm:$0xff]  ;;  %v108_v6 = vld [vmem:[#allocation2 + $0x60] sm:$0xff]  ;;  %v107_v8 = vld [vmem:[#allocation2 + $0x58] sm:$0xff] }
   0x9   :  { %197 = vmatpush.msra.mxu0 %v110_v1  ;;  %v124_v7 = vld [vmem:[#allocation2 + $0xe0] sm:$0xff]  ;;  %v123_v9 = vld [vmem:[#allocation2 + $0xd8] sm:$0xff]  ;;  %v106_v10 = vld [vmem:[#allocation2 + $0x50] sm:$0xff] }
   0xa   :  { %217 = vmatpush.msra.mxu1 %v126_v3  ;;  %v143_v11 = vld [vmem:[#allocation2 + $0x178] sm:$0xff]  ;;  %v122_v12 = vld [vmem:[#allocation2 + $0xd0] sm:$0xff]  ;;  %v141_v15 = vld [vmem:[#allocation2 + $0x168] sm:$0xff] }
   0xb   :  { %198 = vmatpush.msra.mxu0 %v109_v4  ;;  %236 = vmatpush.msra.mxu2 %v143_v11  ;;  %v142_v13 = vld [vmem:[#allocation2 + $0x170] sm:$0xff]  ;;  %v159_v14 = vld [vmem:[#allocation2 + $0x1f8] sm:$0xff]  ;;  %v105_v17 = vld [vmem:[#allocation2 + $0x48] sm:$0xff] }
   0xc   :  { %218 = vmatpush.msra.mxu1 %v125_v5  ;;  %v158_v16 = vld [vmem:[#allocation2 + $0x1f0] sm:$0xff]  ;;  %v121_v18 = vld [vmem:[#allocation2 + $0xc8] sm:$0xff]  ;;  %256 = vmatpush.msra.mxu3 %v159_v14  ;;  %v140_v19 = vld [vmem:[#allocation2 + $0x160] sm:$0xff] }
   0xd   :  { %199 = vmatpush.msra.mxu0 %v108_v6  ;;  %237 = vmatpush.msra.mxu2 %v142_v13  ;;  %v157_v20 = vld [vmem:[#allocation2 + $0x1e8] sm:$0xff]  ;;  %v104_v21 = vld [vmem:[#allocation2 + $0x40] sm:$0xff]  ;;  %v139_v23 = vld [vmem:[#allocation2 + $0x158] sm:$0xff] }
   0xe   :  { %219 = vmatpush.msra.mxu1 %v124_v7  ;;  %v120_v22 = vld [vmem:[#allocation2 + $0xc0] sm:$0xff]  ;;  %257 = vmatpush.msra.mxu3 %v158_v16  ;;  %v103_v25 = vld [vmem:[#allocation2 + $0x38] sm:$0xff]  ;;  %v138_v27 = vld [vmem:[#allocation2 + $0x150] sm:$0xff] }
   0xf   :  { %200 = vmatpush.msra.mxu0 %v107_v8  ;;  %238 = vmatpush.msra.mxu2 %v141_v15  ;;  %v156_v24 = vld [vmem:[#allocation2 + $0x1e0] sm:$0xff]  ;;  %v119_v26 = vld [vmem:[#allocation2 + $0xb8] sm:$0xff]  ;;  %v102_v29 = vld [vmem:[#allocation2 + $0x30] sm:$0xff] }
  0x10   :  { %220 = vmatpush.msra.mxu1 %v123_v9  ;;  %258 = vmatpush.msra.mxu3 %v157_v20  ;;  %v155_v28 = vld [vmem:[#allocation2 + $0x1d8] sm:$0xff]  ;;  %v118_v30 = vld [vmem:[#allocation2 + $0xb0] sm:$0xff]  ;;  %v137_v31 = vld [vmem:[#allocation2 + $0x148] sm:$0xff] }
  0x11   :  { %201 = vmatpush.msra.mxu0 %v106_v10  ;;  %239 = vmatpush.msra.mxu2 %v140_v19  ;;  %v154_v32 = vld [vmem:[#allocation2 + $0x1d0] sm:$0xff]  ;;  %v101_v33 = vld [vmem:[#allocation2 + $0x28] sm:$0xff]  ;;  %v136_v35 = vld [vmem:[#allocation2 + $0x140] sm:$0xff] }
  0x12   :  { %221 = vmatpush.msra.mxu1 %v122_v12  ;;  %259 = vmatpush.msra.mxu3 %v156_v24  ;;  %v117_v34 = vld [vmem:[#allocation2 + $0xa8] sm:$0xff]  ;;  %v100_v37 = vld [vmem:[#allocation2 + $0x20] sm:$0xff]  ;;  %v135_v39 = vld [vmem:[#allocation2 + $0x138] sm:$0xff] }
  0x13   :  { %202 = vmatpush.msra.mxu0 %v105_v17  ;;  %240 = vmatpush.msra.mxu2 %v139_v23  ;;  %v153_v36 = vld [vmem:[#allocation2 + $0x1c8] sm:$0xff]  ;;  %v116_v38 = vld [vmem:[#allocation2 + $0xa0] sm:$0xff]  ;;  %v99_v41 = vld [vmem:[#allocation2 + $0x18] sm:$0xff] }
  0x14   :  { %222 = vmatpush.msra.mxu1 %v121_v18  ;;  %260 = vmatpush.msra.mxu3 %v155_v28  ;;  %v152_v40 = vld [vmem:[#allocation2 + $0x1c0] sm:$0xff]  ;;  %v115_v42 = vld [vmem:[#allocation2 + $0x98] sm:$0xff]  ;;  %v134_v43 = vld [vmem:[#allocation2 + $0x130] sm:$0xff] }
  0x15   :  { %203 = vmatpush.msra.mxu0 %v104_v21  ;;  %241 = vmatpush.msra.mxu2 %v138_v27  ;;  %v151_v44 = vld [vmem:[#allocation2 + $0x1b8] sm:$0xff]  ;;  %v98_v45 = vld [vmem:[#allocation2 + $0x10] sm:$0xff]  ;;  %v133_v47 = vld [vmem:[#allocation2 + $0x128] sm:$0xff] }
  0x16   :  { %223 = vmatpush.msra.mxu1 %v120_v22  ;;  %261 = vmatpush.msra.mxu3 %v154_v32  ;;  %v114_v46 = vld [vmem:[#allocation2 + $0x90] sm:$0xff]  ;;  %v97_v49 = vld [vmem:[#allocation2 + $0x8] sm:$0xff]  ;;  %v132_v51 = vld [vmem:[#allocation2 + $0x120] sm:$0xff] }
  0x17   :  { %204 = vmatpush.msra.mxu0 %v103_v25  ;;  %242 = vmatpush.msra.mxu2 %v137_v31  ;;  %v150_v48 = vld [vmem:[#allocation2 + $0x1b0] sm:$0xff]  ;;  %v113_v50 = vld [vmem:[#allocation2 + $0x88] sm:$0xff]  ;;  %v96_v53 = vld [vmem:[#allocation2] sm:$0xff] }
  0x18   :  { %224 = vmatpush.msra.mxu1 %v119_v26  ;;  %262 = vmatpush.msra.mxu3 %v153_v36  ;;  %v149_v52 = vld [vmem:[#allocation2 + $0x1a8] sm:$0xff]  ;;  %v112_v54 = vld [vmem:[#allocation2 + $0x80] sm:$0xff]  ;;  %v38_v55 = vld [vmem:[%s464_s2] sm:$0xff] }
  0x19   :  { %205 = vmatpush.msra.mxu0 %v102_v29  ;;  %243 = vmatpush.msra.mxu2 %v136_v35  ;;  %v175_v56 = vld [vmem:[#allocation2 + $0x278] sm:$0xff]  ;;  %v174_v57 = vld [vmem:[#allocation2 + $0x270] sm:$0xff]  ;;  %55 = vst [vmem:[#allocation1] ss:$4 sm:$0xff] %v38_v55  ;;  %v148_v60 = vld [vmem:[#allocation2 + $0x1a0] sm:$0xff] }
  0x1a   :  { %225 = vmatpush.msra.mxu1 %v118_v30  ;;  %263 = vmatpush.msra.mxu3 %v152_v40  ;;  %v191_v58 = vld [vmem:[#allocation2 + $0x2f8] sm:$0xff]  ;;  %v173_v62 = vld [vmem:[#allocation2 + $0x268] sm:$0xff]  ;;  %v190_v63 = vld [vmem:[#allocation2 + $0x2f0] sm:$0xff] }
  0x1b   :  { %206 = vmatpush.msra.mxu0 %v101_v33  ;;  %244 = vmatpush.msra.mxu2 %v135_v39  ;;  %v131_v59 = vld [vmem:[#allocation2 + $0x118] sm:$0xff]  ;;  %v189_v0 = vld [vmem:[#allocation2 + $0x2e8] sm:$0xff]  ;;  %v130_v1 = vld [vmem:[#allocation2 + $0x110] sm:$0xff] }
  0x1c   :  { %226 = vmatpush.msra.mxu1 %v117_v34  ;;  %264 = vmatpush.msra.mxu3 %v151_v44  ;;  %v434_v61 = vld [vmem:[%s462_s0] sm:$0x3f]  ;;  %v172_v4 = vld [vmem:[#allocation2 + $0x260] sm:$0xff]  ;;  %v129_v6 = vld [vmem:[#allocation2 + $0x108] sm:$0xff] }
  0x1d   :  { %207 = vmatpush.msra.mxu0 %v100_v37  ;;  %245 = vmatpush.msra.mxu2 %v134_v43  ;;  %v147_v2 = vld [vmem:[#allocation2 + $0x198] sm:$0xff]  ;;  %v188_v5 = vld [vmem:[#allocation2 + $0x2e0] sm:$0xff]  ;;  %v146_v7 = vld [vmem:[#allocation2 + $0x190] sm:$0xff]  ;;  %v43_v8 = vperm.slane %v434_v61, 2  ;;  %v41_v9 = vperm.slane %v434_v61, 0  ;;  %v44_v11 = vperm.slane %v434_v61, 3 }
  0x1e   :  { %227 = vmatpush.msra.mxu1 %v116_v38  ;;  %265 = vmatpush.msra.mxu3 %v150_v48  ;;  %v439_v3 = vld [vmem:[%s463_s1] sm:$0x3f]  ;;  %v39_v10 = vld [vmem:[%s464_s2 + $0x8] sm:$0xf]  ;;  %v42_v12 = vperm.slane %v434_v61, 1  ;;  %v145_v16 = vld [vmem:[#allocation2 + $0x188] sm:$0xff] }
  0x1f   :  { %208 = vmatpush.msra.mxu0 %v99_v41  ;;  %246 = vmatpush.msra.mxu2 %v133_v47  ;;  %57 = vst [vmem:[#allocation1 + $0x20] ss:$4 sm:$0xff] %v39_v10  ;;  %v171_v13 = vld [vmem:[#allocation2 + $0x258] sm:$0xff]  ;;  %v128_v15 = vld [vmem:[#allocation2 + $0x100] sm:$0xff]  ;;  %v80_v17 = vperm.slane %v439_v3, 2  ;;  %v78_v18 = vperm.slane %v439_v3, 0 }
  0x20   :  { %228 = vmatpush.msra.mxu1 %v115_v42  ;;  %266 = vmatpush.msra.mxu3 %v149_v52  ;;  %v187_v14 = vld [vmem:[#allocation2 + $0x2d8] sm:$0xff]  ;;  %v81_v19 = vperm.slane %v439_v3, 3  ;;  %v79_v20 = vperm.slane %v439_v3, 1  ;;  %v60_v21 = vld.sshfl [vmem:[#allocation1 + $0x10] sm:$0xff pattern:$0x73625140] }
  0x21   :  { %209 = vmatpush.msra.mxu0 %v98_v45  ;;  %247 = vmatpush.msra.mxu2 %v132_v51  ;;  %v58_v22 = vld.sshfl [vmem:[#allocation1] sm:$0xff pattern:$0x73625140]  ;;  %v72_v23 = vmul.f32 %v60_v21, %v43_v8  ;;  %v61_v25 = vld.sshfl [vmem:[#allocation1 + $0x18] sm:$0xff pattern:$0x73625140] }
  0x22   :  { %229 = vmatpush.msra.mxu1 %v114_v46  ;;  %267 = vmatpush.msra.mxu3 %v148_v60  ;;  %v70_v24 = vmul.f32 %v58_v22, %v41_v9  ;;  %v59_v26 = vld.sshfl [vmem:[#allocation1 + $0x8] sm:$0xff pattern:$0x73625140]  ;;  %v73_v28 = vmul.f32 %v61_v25, %v44_v11  ;;  %v170_v30 = vld [vmem:[#allocation2 + $0x250] sm:$0xff]  ;;  %v169_v35 = vld [vmem:[#allocation2 + $0x248] sm:$0xff]  ;;  %v45_v48 = vperm.slane %v434_v61, 4 }
  0x23   :  { %210 = vmatpush.msra.mxu0 %v97_v49  ;;  %248 = vmatpush.msra.mxu2 %v131_v59  ;;  %v144_v27 = vld [vmem:[#allocation2 + $0x180] sm:$0xff]  ;;  %v71_v29 = vmul.f32 %v59_v26, %v42_v12  ;;  %v186_v31 = vld [vmem:[#allocation2 + $0x2d0] sm:$0xff]  ;;  %v92_v32 = vadd.f32 %v80_v17, %v72_v23  ;;  %v185_v36 = vld [vmem:[#allocation2 + $0x2c8] sm:$0xff]  ;;  %v46_v49 = vperm.slane %v434_v61, 5  ;;  %v83_v59 = vperm.slane %v439_v3, 5 }
  0x24   :  { %230 = vmatpush.msra.mxu1 %v113_v50  ;;  %268 = vmatpush.msra.mxu3 %v147_v2  ;;  %v90_v33 = vadd.f32 %v78_v18, %v70_v24  ;;  %v93_v34 = vadd.f32 %v81_v19, %v73_v28  ;;  %v168_v38 = vld [vmem:[#allocation2 + $0x240] sm:$0xff]  ;;  %v167_v40 = vld [vmem:[#allocation2 + $0x238] sm:$0xff]  ;;  %v166_v42 = vld [vmem:[#allocation2 + $0x230] sm:$0xff] }
  0x25   :  { %211 = vmatpush.msra.mxu0 %v96_v53  ;;  %249 = vmatpush.msra.mxu2 %v130_v1  ;;  %v91_v37 = vadd.f32 %v79_v20, %v71_v29  ;;  %v184_v39 = vld [vmem:[#allocation2 + $0x2c0] sm:$0xff]  ;;  %v183_v41 = vld [vmem:[#allocation2 + $0x2b8] sm:$0xff]  ;;  %v182_v43 = vld [vmem:[#allocation2 + $0x2b0] sm:$0xff] }
  0x26   :  { %231 = vmatpush.msra.mxu1 %v112_v54  ;;  %269 = vmatpush.msra.mxu3 %v146_v7  ;;  %v165_v44 = vld [vmem:[#allocation2 + $0x228] sm:$0xff]  ;;  %v164_v46 = vld [vmem:[#allocation2 + $0x220] sm:$0xff]  ;;  %v62_v50 = vld.sshfl [vmem:[#allocation1 + $0x20] sm:$0xff pattern:$0x73625140] }
  0x27   :  { %276 = vmatpush.msrb.mxu0 %v175_v56  ;;  %250 = vmatpush.msra.mxu2 %v129_v6  ;;  %v181_v45 = vld [vmem:[#allocation2 + $0x2a8] sm:$0xff]  ;;  %v180_v47 = vld [vmem:[#allocation2 + $0x2a0] sm:$0xff]  ;;  %v163_v52 = vld [vmem:[#allocation2 + $0x218] sm:$0xff]  ;;  %v74_v56 = vmul.f32 %v62_v50, %v45_v48 }
  0x28   :  { %296 = vmatpush.msrb.mxu1 %v191_v58  ;;  %270 = vmatpush.msra.mxu3 %v145_v16  ;;  %v63_v51 = vld.sshfl [vmem:[#allocation1 + $0x28] sm:$0xff pattern:$0x73625140]  ;;  %v179_v53 = vld [vmem:[#allocation2 + $0x298] sm:$0xff]  ;;  %v162_v54 = vld [vmem:[#allocation2 + $0x210] sm:$0xff] }
  0x29   :  { %277 = vmatpush.msrb.mxu0 %v174_v57  ;;  %251 = vmatpush.msra.mxu2 %v128_v15  ;;  %v178_v55 = vld [vmem:[#allocation2 + $0x290] sm:$0xff]  ;;  %v82_v57 = vperm.slane %v439_v3, 4  ;;  %v75_v58 = vmul.f32 %v63_v51, %v46_v49  ;;  %v161_v60 = vld [vmem:[#allocation2 + $0x208] sm:$0xff]  ;;  %v338_v2 = vld [vmem:[%s466_s4] ss:$0 sm:$0xff] }
  0x2a   :  { %297 = vmatpush.msrb.mxu1 %v190_v63  ;;  %252 = vmatmul.f32.vlgmr.msra.gmra.mxu2 %v92_v32  ;;  %v177_v61 = vld [vmem:[#allocation2 + $0x288] sm:$0xff] }
  0x2b   :  { %278 = vmatpush.msrb.mxu0 %v173_v62  ;;  %271 = vmatpush.msra.mxu3 %v144_v27  ;;  %v160_v62 = vld [vmem:[#allocation2 + $0x200] sm:$0xff]  ;;  %v94_v63 = vadd.f32 %v82_v57, %v74_v56  ;;  %v95_v1 = vadd.f32 %v83_v59, %v75_v58 }
  0x2c   :  { %298 = vmatpush.msrb.mxu1 %v189_v0  ;;  %212 = vmatmul.f32.vlgmr.msra.gmra.mxu0 %v90_v33  ;;  %v176_v0 = vld [vmem:[#allocation2 + $0x280] sm:$0xff] }
  0x2d   :  { %279 = vmatpush.msrb.mxu0 %v172_v4  ;;  %272 = vmatmul.f32.vlgmr.msra.gmra.mxu3 %v93_v34 }
  0x2e   :  { %299 = vmatpush.msrb.mxu1 %v188_v5 }
  0x2f   :  { %280 = vmatpush.msrb.mxu0 %v171_v13  ;;  %232 = vmatmul.f32.vlgmr.msra.gmra.mxu1 %v91_v37 }
  0x30   :  { %300 = vmatpush.msrb.mxu1 %v187_v14 }
  0x31   :  { %281 = vmatpush.msrb.mxu0 %v170_v30 }
  0x32   :  { %301 = vmatpush.msrb.mxu1 %v186_v31 }
  0x33   :  { %282 = vmatpush.msrb.mxu0 %v169_v35 }
  0x34   :  { %302 = vmatpush.msrb.mxu1 %v185_v36 }
  0x35   :  { %283 = vmatpush.msrb.mxu0 %v168_v38 }
  0x36   :  { %303 = vmatpush.msrb.mxu1 %v184_v39 }
  0x37   :  { %284 = vmatpush.msrb.mxu0 %v167_v40 }
  0x38   :  { %304 = vmatpush.msrb.mxu1 %v183_v41 }
  0x39   :  { %285 = vmatpush.msrb.mxu0 %v166_v42 }
  0x3a   :  { %305 = vmatpush.msrb.mxu1 %v182_v43 }
  0x3b   :  { %286 = vmatpush.msrb.mxu0 %v165_v44 }
  0x3c   :  { %306 = vmatpush.msrb.mxu1 %v181_v45 }
  0x3d   :  { %287 = vmatpush.msrb.mxu0 %v164_v46 }
  0x3e   :  { %307 = vmatpush.msrb.mxu1 %v180_v47 }
  0x3f   :  { %288 = vmatpush.msrb.mxu0 %v163_v52 }
  0x40   :  { %308 = vmatpush.msrb.mxu1 %v179_v53 }
  0x41   :  { %289 = vmatpush.msrb.mxu0 %v162_v54 }
  0x42   :  { %309 = vmatpush.msrb.mxu1 %v178_v55 }
  0x43   :  { %290 = vmatpush.msrb.mxu0 %v161_v60 }
  0x44   :  { %310 = vmatpush.msrb.mxu1 %v177_v61 }
  0x45   :  { %291 = vmatpush.msrb.mxu0 %v160_v62 }
  0x46   :  { %311 = vmatpush.msrb.mxu1 %v176_v0  ;;  %292 = vmatmul.f32.vlgmr.msrb.gmra.mxu0 %v94_v63 }
  0x47   :  { %312 = vmatmul.f32.vlgmr.msrb.gmra.mxu1 %v95_v1 }
  0xa9   :  { %v213_v3 = vpop.f32.mrf.mxu0 }
  0xaa   :  { %v214_v4 = vadd.f32 %v338_v2, %v213_v3 }
  0xac   :  { %v233_v5 = vpop.f32.mrf.mxu1 }
  0xad   :  { %v234_v6 = vadd.f32 %v233_v5, %v214_v4  ;;  %v253_v7 = vpop.f32.mrf.mxu2 }
  0xaf   :  { %v254_v8 = vadd.f32 %v253_v7, %v234_v6 }
  0xb0   :  { %v273_v9 = vpop.f32.mrf.mxu3 }
  0xb1   :  { %v274_v10 = vadd.f32 %v273_v9, %v254_v8 }
  0xc3   :  { %v293_v11 = vpop.f32.mrf.mxu0 }
  0xc4   :  { %v313_v12 = vpop.f32.mrf.mxu1  ;;  %v294_v13 = vadd.f32 %v293_v11, %v274_v10 }
  0xc6   :  { %v314_v14 = vadd.f32 %v313_v12, %v294_v13 }
  0xc8   :  { %316 = vst [vmem:[#allocation5] sm:$0x3] %v314_v14 }
  0xc9   :  { %327 = dma.vmem_to_hbm [thread:$0]  %s323_s7, 32, %s325_s10, [#allocation4]  }
  0xca   :  { %389 = dma.done.wait [#allocation4], 32  }
  0xcb   :  { %390 = vsyncadd [#allocation4], 4294967264 }
  0xcc   :  { %332 = vsyncpa [#allocation3], 1 }
  0xcd   :  { %333 = vsyncpa [#allocation4], 1 }

</bundles_post_ra>
